<compile_context>
chip_gen: v7x
topology: tpu7x:2x2x1
jax: 0.10.0
libtpu: 0.0.40
codegen_flags: <defaults>
</compile_context>

<pallas_src>
import functools

import numpy as np
import jax
import jax.numpy as jnp
from jax.experimental import pallas as pl
from jax.experimental.pallas import tpu as pltpu


def _round_up(x, m):
    return ((x + m - 1) // m) * m


_ROW_TILE = 256   # row (node) tile: multiple of 8 sublanes, fits v5e scoped VMEM
_LANE_PAD = 256   # contraction / label-class pad: full 256-wide MXU on v6e/v7x


# ---------------------------------------------------------------------------
# Pallas kernel: one WL neighbor-label-histogram step (MXU matmul, bf16 in /
# f32 accumulate, int32 out).
# ---------------------------------------------------------------------------
def _wl_hist_kernel(adj_ref, onehot_ref, hist_ref):
    # adj_ref:    (TM, NP_C)  bf16   row tile of the zero-padded adjacency
    # onehot_ref: (NP_C, K)   bf16   one-hot of current WL labels (constant
    #                                block index -> fetched once per core,
    #                                resident across grid steps)
    # hist_ref:   (TM, K)     int32  neighbor-label histogram tile
    hist_ref[...] = jax.lax.dot_general(
        adj_ref[...], onehot_ref[...],
        dimension_numbers=(((1,), (0,)), ((), ())),
        preferred_element_type=jnp.float32,
    ).astype(jnp.int32)


def wl_histogram(adj_pad, onehot):
    """One WL neighbor-aggregation step on the padded dense graph."""
    np_rows, np_cols = adj_pad.shape
    k_lbl = onehot.shape[1]
    tm = min(_ROW_TILE, np_rows)
    assert np_rows % tm == 0

    # Per-step VMEM footprint with double-buffering for every operand:
    # adj tile (bf16) + resident one-hot (bf16) + int32 output tile, + headroom.
    vmem_bytes = 2 * (tm * np_cols * 2 + np_cols * k_lbl * 2 + tm * k_lbl * 4)
    vmem_bytes = int(vmem_bytes + (4 << 20))

    return pl.pallas_call(
        _wl_hist_kernel,
        out_shape=jax.ShapeDtypeStruct((np_rows, k_lbl), jnp.int32),
        grid_spec=pltpu.PrefetchScalarGridSpec(
            num_scalar_prefetch=0,
            grid=(np_rows // tm,),
            in_specs=[
                pl.BlockSpec((tm, np_cols), lambda i: (i, 0)),
                pl.BlockSpec((np_cols, k_lbl), lambda i: (0, 0)),
            ],
            out_specs=pl.BlockSpec((tm, k_lbl), lambda i: (i, 0)),
        ),
        compiler_params=pltpu.CompilerParams(
            dimension_semantics=("parallel",),   # row tiles are independent
            vmem_limit_bytes=vmem_bytes,
        ),
    )(adj_pad, onehot)


# ---------------------------------------------------------------------------
# Device-side WL label compression (runs under the same jit as the kernel).
# ---------------------------------------------------------------------------
def _compress_labels(labels, hist_i, r1, r2, w1, w2):
    """Compress (own label, neighbor-label histogram) signatures to dense ids.

    Signatures are hashed into two independent 32-bit lanes (wraparound int32
    arithmetic), then compared pairwise: O(N^2) scalar compares instead of
    O(N^2 * K).  Collision probability per pair is ~2^-60, negligible.
    TODO(synk): the reference uses an opaque hash inside
    weisfeiler_lehman_labels_from_edge_list; we compress by first-occurrence
    rank, which yields an equivalent WL partition (ids may be permuted).
    """
    n = labels.shape[0]
    h1 = labels * w1 + jnp.sum(hist_i * r1[None, :], axis=1)
    h2 = labels * w2 + jnp.sum(hist_i * r2[None, :], axis=1)
    eq = (h1[:, None] == h1[None, :]) & (h2[:, None] == h2[None, :])   # (n, n)
    idx = jnp.arange(n, dtype=jnp.int32)
    # first node index sharing node i's signature
    rep = jnp.min(jnp.where(eq, idx[None, :], n), axis=1).astype(jnp.int32)
    is_first = rep == idx
    # new label = rank of this node's class representative among first
    # occurrences -> dense ids 0..num_classes-1
    new = jnp.cumsum(is_first.astype(jnp.int32))[rep] - 1
    return new.astype(jnp.int32)


@functools.partial(jax.jit, static_argnums=(1, 2))
def _wl_refine(adj_pad, node_num, max_iterations):
    """Fused 3-iteration WL refinement: Pallas histogram + jnp compression,
    all on device; only the final (node_num, 1) labels leave the chip."""
    np_cols = adj_pad.shape[1]
    class_ids = jnp.arange(np_cols, dtype=jnp.int32)

    # Deterministic hash weights for signature compression (trace-time consts).
    rng = np.random.RandomState(0x5BD1E995)
    r1 = jnp.asarray(rng.randint(1, 2**31 - 1, size=np_cols, dtype=np.int64),
                     dtype=jnp.int32)
    r2 = jnp.asarray(rng.randint(1, 2**31 - 1, size=np_cols, dtype=np.int64),
                     dtype=jnp.int32)
    w1 = jnp.int32(int(rng.randint(1, 2**31 - 1)))
    w2 = jnp.int32(int(rng.randint(1, 2**31 - 1)))

    labels = jnp.zeros((node_num,), dtype=jnp.int32)   # uniform initial labels
    for _ in range(max_iterations):
        # Padded label slots keep label 0, which is harmless because their
        # adjacency columns are all zero.
        labels_pad = jnp.zeros((np_cols,), jnp.int32).at[:node_num].set(labels)
        onehot = (labels_pad[:, None] == class_ids[None, :]).astype(jnp.bfloat16)
        hist = wl_histogram(adj_pad, onehot)           # (np_rows, np_cols) int32
        labels = _compress_labels(labels, hist[:node_num], r1, r2, w1, w2)
    return labels.reshape(node_num, 1)


# ---------------------------------------------------------------------------
# Glue identical in semantics to the reference forward().
# ---------------------------------------------------------------------------
def _edges_from_dict(edge_dic_list):
    """Same edge construction as the reference forward()."""
    edges = []
    for node in edge_dic_list:
        neighs = np.array(edge_dic_list[node]).reshape(-1, 1)
        a = np.array([node]).repeat(len(neighs)).reshape(-1, 1)
        edges.append(np.concatenate([a, neighs], axis=1))
    return edges


def weisfeiler_lehman_labels_pallas(edges, max_iterations, node_num):
    """WL label refinement; neighbor aggregation runs in the Pallas kernel.

    Returns int32 labels of shape (node_num, 1).
    """
    # TODO(synk): for node_num beyond 2048 the resident one-hot (N^2 bf16)
    # outgrows VMEM; tile the contraction/label axis with an f32 accumulator.
    assert node_num <= 2048, "contraction-axis tiling for large graphs not implemented"

    np_rows = _round_up(node_num, _ROW_TILE)   # row-tile pad
    np_cols = _round_up(node_num, _LANE_PAD)   # lane / contraction / label pad

    # Dense symmetric adjacency (glue); stored bf16 (exact for 0/1 entries).
    adj = np.zeros((np_rows, np_cols), dtype=np.float32)
    for e in edges:
        for u, v in e:
            adj[u, v] = 1.0
            adj[v, u] = 1.0
    adj_pad = jnp.asarray(adj, dtype=jnp.bfloat16)

    return _wl_refine(adj_pad, node_num, max_iterations)


class MeanAggregatorPallas:
    def __init__(self, a_dim, b_dim, key):
        # nn.Sequential(nn.Linear(a_dim, b_dim)) -- deterministic init.
        # (Unused in forward(), matching the reference implementation.)
        kw, kb = jax.random.split(key)
        bound = 1.0 / np.sqrt(a_dim)
        self.mlp_w = jax.random.uniform(kw, (a_dim, b_dim), jnp.float32,
                                        -bound, bound)
        self.mlp_b = jax.random.uniform(kb, (b_dim,), jnp.float32,
                                        -bound, bound)

    def forward(self, edge_dic_list: dict, node_num):
        edges = _edges_from_dict(edge_dic_list)
        max_iterations = 3
        output_extra_features = weisfeiler_lehman_labels_pallas(
            edges, max_iterations, node_num)
        return output_extra_features


if __name__ == "__main__":
    key = jax.random.PRNGKey(0)
    k_graph, k_params = jax.random.split(key)

    node_num = 16
    a_dim, b_dim = 32, 32

    # Deterministic small neighbor dict: each node gets 3 pseudo-random neighbors.
    neigh_idx = np.asarray(jax.random.randint(k_graph, (node_num, 3), 0, node_num))
    edge_dic_list = {
        int(n): [int(v) for v in neigh_idx[n] if int(v) != n] or [(n + 1) % node_num]
        for n in range(node_num)
    }

    agg = MeanAggregatorPallas(a_dim, b_dim, k_params)
    out = agg.forward(edge_dic_list, node_num)
    out = jax.block_until_ready(out)

    assert out.shape == (node_num, 1)
    assert out.dtype == jnp.int32
    print("KERNEL_OK")
</pallas_src>

<mosaic_0001>
module attributes {stable_mosaic.version = 11 : i64} {
  func.func @_wl_hist_kernel(%arg0: i32, %arg1: memref<256x256xbf16, #tpu.memory_space<vmem>>, %arg2: memref<256x256xbf16, #tpu.memory_space<vmem>>, %arg3: memref<256x256xi32, #tpu.memory_space<vmem>>) attributes {dimension_semantics = [#tpu.dimension_semantics<parallel>], iteration_bounds = array<i64: 1>, scalar_prefetch = 0 : i64, scratch_operands = 0 : i64, tpu.core_type = #tpu.core_type<tc>, window_params = [{transform_indices = @transform_0, window_bounds = array<i64: 256, 256>}, {pipeline_mode = #tpu.pipeline_mode<synchronous>, transform_indices = @transform_1, window_bounds = array<i64: 256, 256>}, {transform_indices = @transform_2, window_bounds = array<i64: 256, 256>}]} {
    %c0 = arith.constant 0 : index
    %c0_0 = arith.constant 0 : index
    %0 = vector.load %arg1[%c0, %c0_0] : memref<256x256xbf16, #tpu.memory_space<vmem>>, vector<256x256xbf16>
    %c0_1 = arith.constant 0 : index
    %c0_2 = arith.constant 0 : index
    %1 = vector.load %arg2[%c0_1, %c0_2] : memref<256x256xbf16, #tpu.memory_space<vmem>>, vector<256x256xbf16>
    %cst = arith.constant dense<0.000000e+00> : vector<256x256xf32>
    %2 = tpu.matmul %0, %1, %cst {dimension_numbers = #tpu.dot_dimension_numbers<[1], [0], [0], [1], [0, 0, 1, 1], [], []>} : vector<256x256xbf16>, vector<256x256xbf16>, vector<256x256xf32> -> vector<256x256xf32>
    %3 = arith.fptosi %2 : vector<256x256xf32> to vector<256x256xi32>
    %c0_3 = arith.constant 0 : index
    %c0_4 = arith.constant 0 : index
    %4 = vector.load %arg3[%c0_3, %c0_4] : memref<256x256xi32, #tpu.memory_space<vmem>>, vector<256x256xi32>
    tpu.vector_store %arg3[%c0_3, %c0_4], %3 {strides = array<i32>} : memref<256x256xi32, #tpu.memory_space<vmem>>, vector<256x256xi32>,
    return
  }
  func.func @transform_0(%arg0: i32) -> (i32, i32) {
    %c0_i32 = arith.constant 0 : i32
    %c0_i32_0 = arith.constant 0 : i32
    return %arg0, %c0_i32 : i32, i32
  }
  func.func @transform_1(%arg0: i32) -> (i32, i32) {
    %c0_i32 = arith.constant 0 : i32
    %c0_i32_0 = arith.constant 0 : i32
    %c0_i32_1 = arith.constant 0 : i32
    return %c0_i32, %c0_i32_0 : i32, i32
  }
  func.func @transform_2(%arg0: i32) -> (i32, i32) {
    %c0_i32 = arith.constant 0 : i32
    %c0_i32_0 = arith.constant 0 : i32
    return %arg0, %c0_i32 : i32, i32
  }
}

</mosaic_0001>

<bundles_post_ra>
// kernel: _wl_refine.3
= control target key start
LH: loop header
LB: loop body
LE: loop exit
PB: predicated region body
PF: predicated region fallthrough
CT: control target
= control target key end

     0   :  { %s1439_s1 = inlined_call_operand.vmem [shape: bf16[256,256], index: 1, kind: input, shape index: {}]   ;;  %s1440_s0 = inlined_call_operand.vmem [shape: bf16[256,256], index: 0, kind: input, shape index: {}]   ;;  %s1441_s2 = inlined_call_operand.vmem [shape: s32[256,256], index: 2, kind: output, shape index: {}]  }
   0x1   :  { %v944_v0 = vld [vmem:[%s1439_s1 + $0x4] ss:$8 sps:$4 sm:$0xff]   ;;  %v946_v1 = vld [vmem:[%s1439_s1] ss:$8 sps:$4 sm:$0xff]   ;;  %v947_v2 = vld [vmem:[%s1439_s1 + $0x14] ss:$8 sps:$4 sm:$0xff]  }
   0x2   :  { %395 = vmatprep.subr.bf16.mxu0 %v944_v0  ;;  %784 = vmatprep.subr.bf16.mxu1 %v944_v0  ;;  %v949_v3 = vld [vmem:[%s1439_s1 + $0x10] ss:$8 sps:$4 sm:$0xff]   ;;  %v950_v4 = vld [vmem:[%s1439_s1 + $0x24] ss:$8 sps:$4 sm:$0xff]   ;;  %v952_v5 = vld [vmem:[%s1439_s1 + $0x20] ss:$8 sps:$4 sm:$0xff]  }
   0x3   :  { %396 = vmatpush1.bf16.msra.mxu0 %v946_v1  ;;  %800 = vmatpush1.bf16.msra.mxu1 %v946_v1  ;;  %v953_v6 = vld [vmem:[%s1439_s1 + $0x34] ss:$8 sps:$4 sm:$0xff]   ;;  %v955_v7 = vld [vmem:[%s1439_s1 + $0x30] ss:$8 sps:$4 sm:$0xff]   ;;  %v956_v8 = vld [vmem:[%s1439_s1 + $0x44] ss:$8 sps:$4 sm:$0xff]  }
   0x4   :  { %397 = vmatprep.subr.bf16.mxu0 %v947_v2  ;;  %785 = vmatprep.subr.bf16.mxu1 %v947_v2  ;;  %v958_v9 = vld [vmem:[%s1439_s1 + $0x40] ss:$8 sps:$4 sm:$0xff]   ;;  %v959_v10 = vld [vmem:[%s1439_s1 + $0x54] ss:$8 sps:$4 sm:$0xff]   ;;  %v961_v11 = vld [vmem:[%s1439_s1 + $0x50] ss:$8 sps:$4 sm:$0xff]  }
   0x5   :  { %v962_v12 = vld [vmem:[%s1439_s1 + $0x64] ss:$8 sps:$4 sm:$0xff]   ;;  %v964_v14 = vld [vmem:[%s1439_s1 + $0x60] ss:$8 sps:$4 sm:$0xff]   ;;  %v965_v16 = vld [vmem:[%s1439_s1 + $0x74] ss:$8 sps:$4 sm:$0xff]  }
   0x6   :  { %v994_v13 = vld [vmem:[%s1440_s0 + $0x4] ss:$8 sps:$4 sm:$0xff]   ;;  %v967_v17 = vld [vmem:[%s1439_s1 + $0x70] ss:$8 sps:$4 sm:$0xff]   ;;  %v970_v19 = vld [vmem:[%s1439_s1 + $0x80] ss:$8 sps:$4 sm:$0xff]  }
   0x7   :  { %398 = vmatpush1.bf16.msra.mxu0 %v949_v3  ;;  %801 = vmatpush1.bf16.msra.mxu1 %v949_v3  ;;  %v997_v15 = vld [vmem:[%s1440_s0 + $0x84] ss:$8 sps:$4 sm:$0xff]   ;;  %v971_v20 = vld [vmem:[%s1439_s1 + $0x94] ss:$8 sps:$4 sm:$0xff]   ;;  %v973_v21 = vld [vmem:[%s1439_s1 + $0x90] ss:$8 sps:$4 sm:$0xff]  }
   0x8   :  { %399 = vmatprep.subr.bf16.mxu0 %v950_v4  ;;  %786 = vmatprep.subr.bf16.mxu1 %v950_v4  ;;  %v968_v18 = vld [vmem:[%s1439_s1 + $0x84] ss:$8 sps:$4 sm:$0xff]   ;;  %v976_v23 = vld [vmem:[%s1439_s1 + $0xa0] ss:$8 sps:$4 sm:$0xff]   ;;  %v977_v24 = vld [vmem:[%s1439_s1 + $0xb4] ss:$8 sps:$4 sm:$0xff]  }
   0x9   :  { %427 = vmatprep.mubr.bf16.mxu0 %v994_v13  ;;  %507 = vmatprep.mubr.bf16.mxu1 %v997_v15  ;;  %v974_v22 = vld [vmem:[%s1439_s1 + $0xa4] ss:$8 sps:$4 sm:$0xff]   ;;  %v979_v25 = vld [vmem:[%s1439_s1 + $0xb0] ss:$8 sps:$4 sm:$0xff]   ;;  %v982_v27 = vld [vmem:[%s1439_s1 + $0xc0] ss:$8 sps:$4 sm:$0xff]  }
   0xa   :  { %v980_v26 = vld [vmem:[%s1439_s1 + $0xc4] ss:$8 sps:$4 sm:$0xff]   ;;  %v983_v28 = vld [vmem:[%s1439_s1 + $0xd4] ss:$8 sps:$4 sm:$0xff]   ;;  %v985_v29 = vld [vmem:[%s1439_s1 + $0xd0] ss:$8 sps:$4 sm:$0xff]  }
   0xb   :  { %400 = vmatpush1.bf16.msra.mxu0 %v952_v5  ;;  %802 = vmatpush1.bf16.msra.mxu1 %v952_v5  ;;  %v986_v30 = vld [vmem:[%s1439_s1 + $0xe4] ss:$8 sps:$4 sm:$0xff]   ;;  %v988_v31 = vld [vmem:[%s1439_s1 + $0xe0] ss:$8 sps:$4 sm:$0xff]   ;;  %v989_v32 = vld [vmem:[%s1439_s1 + $0xf4] ss:$8 sps:$4 sm:$0xff]  }
   0xc   :  { %401 = vmatprep.subr.bf16.mxu0 %v953_v6  ;;  %787 = vmatprep.subr.bf16.mxu1 %v953_v6  ;;  %v991_v33 = vld [vmem:[%s1439_s1 + $0xf0] ss:$8 sps:$4 sm:$0xff]   ;;  %v992_v34 = vld [vmem:[%s1440_s0] ss:$8 sps:$4 sm:$0xff]   ;;  %v998_v36 = vld [vmem:[%s1440_s0 + $0x14] ss:$8 sps:$4 sm:$0xff]  }
   0xd   :  { %v995_v35 = vld [vmem:[%s1440_s0 + $0x80] ss:$8 sps:$4 sm:$0xff]   ;;  %v1000_v37 = vld [vmem:[%s1440_s0 + $0x94] ss:$8 sps:$4 sm:$0xff]   ;;  %v1002_v38 = vld [vmem:[%s1440_s0 + $0x10] ss:$8 sps:$4 sm:$0xff]  }
   0xe   :  { %v1003_v39 = vld [vmem:[%s1440_s0 + $0x90] ss:$8 sps:$4 sm:$0xff]   ;;  %v1004_v40 = vld [vmem:[%s1440_s0 + $0x24] ss:$8 sps:$4 sm:$0xff]   ;;  %v1008_v42 = vld [vmem:[%s1440_s0 + $0x20] ss:$8 sps:$4 sm:$0xff]  }
   0xf   :  { %402 = vmatpush1.bf16.msra.mxu0 %v955_v7  ;;  %803 = vmatpush1.bf16.msra.mxu1 %v955_v7  ;;  %v1006_v41 = vld [vmem:[%s1440_s0 + $0xa4] ss:$8 sps:$4 sm:$0xff]   ;;  %v1009_v43 = vld [vmem:[%s1440_s0 + $0xa0] ss:$8 sps:$4 sm:$0xff]   ;;  %v1010_v44 = vld [vmem:[%s1440_s0 + $0x34] ss:$8 sps:$4 sm:$0xff]  }
  0x10   :  { %403 = vmatprep.subr.bf16.mxu0 %v956_v8  ;;  %788 = vmatprep.subr.bf16.mxu1 %v956_v8  ;;  %v1012_v45 = vld [vmem:[%s1440_s0 + $0xb4] ss:$8 sps:$4 sm:$0xff]   ;;  %v1014_v46 = vld [vmem:[%s1440_s0 + $0x30] ss:$8 sps:$4 sm:$0xff]   ;;  %v1016_v48 = vld [vmem:[%s1440_s0 + $0x44] ss:$8 sps:$4 sm:$0xff]  }
  0x11   :  { %v1015_v47 = vld [vmem:[%s1440_s0 + $0xb0] ss:$8 sps:$4 sm:$0xff]   ;;  %v1018_v49 = vld [vmem:[%s1440_s0 + $0xc4] ss:$8 sps:$4 sm:$0xff]   ;;  %v1020_v50 = vld [vmem:[%s1440_s0 + $0x40] ss:$8 sps:$4 sm:$0xff]  }
  0x12   :  { %v1021_v51 = vld [vmem:[%s1440_s0 + $0xc0] ss:$8 sps:$4 sm:$0xff]   ;;  %v1022_v52 = vld [vmem:[%s1440_s0 + $0x54] ss:$8 sps:$4 sm:$0xff]   ;;  %v1026_v54 = vld [vmem:[%s1440_s0 + $0x50] ss:$8 sps:$4 sm:$0xff]  }
  0x13   :  { %404 = vmatpush1.bf16.msra.mxu0 %v958_v9  ;;  %804 = vmatpush1.bf16.msra.mxu1 %v958_v9  ;;  %v1024_v53 = vld [vmem:[%s1440_s0 + $0xd4] ss:$8 sps:$4 sm:$0xff]   ;;  %v1027_v55 = vld [vmem:[%s1440_s0 + $0xd0] ss:$8 sps:$4 sm:$0xff]   ;;  %v1028_v56 = vld [vmem:[%s1440_s0 + $0x64] ss:$8 sps:$4 sm:$0xff]  }
  0x14   :  { %405 = vmatprep.subr.bf16.mxu0 %v959_v10  ;;  %789 = vmatprep.subr.bf16.mxu1 %v959_v10  ;;  %v1030_v57 = vld [vmem:[%s1440_s0 + $0xe4] ss:$8 sps:$4 sm:$0xff]   ;;  %v1032_v58 = vld [vmem:[%s1440_s0 + $0x60] ss:$8 sps:$4 sm:$0xff]   ;;  %v1034_v60 = vld [vmem:[%s1440_s0 + $0x74] ss:$8 sps:$4 sm:$0xff]  }
  0x15   :  { %v1033_v59 = vld [vmem:[%s1440_s0 + $0xe0] ss:$8 sps:$4 sm:$0xff]   ;;  %v1036_v61 = vld [vmem:[%s1440_s0 + $0xf4] ss:$8 sps:$4 sm:$0xff]   ;;  %v1038_v62 = vld [vmem:[%s1440_s0 + $0x70] ss:$8 sps:$4 sm:$0xff]  }
  0x16   :  { %v1039_v63 = vld [vmem:[%s1440_s0 + $0xf0] ss:$8 sps:$4 sm:$0xff]  }
  0x17   :  { %406 = vmatpush1.bf16.msra.mxu0 %v961_v11  ;;  %805 = vmatpush1.bf16.msra.mxu1 %v961_v11 }
  0x18   :  { %407 = vmatprep.subr.bf16.mxu0 %v962_v12  ;;  %790 = vmatprep.subr.bf16.mxu1 %v962_v12 }
  0x1b   :  { %408 = vmatpush1.bf16.msra.mxu0 %v964_v14  ;;  %806 = vmatpush1.bf16.msra.mxu1 %v964_v14 }
  0x1c   :  { %409 = vmatprep.subr.bf16.mxu0 %v965_v16  ;;  %791 = vmatprep.subr.bf16.mxu1 %v965_v16 }
  0x1f   :  { %410 = vmatpush1.bf16.msra.mxu0 %v967_v17  ;;  %807 = vmatpush1.bf16.msra.mxu1 %v967_v17 }
  0x20   :  { %411 = vmatprep.subr.bf16.mxu0 %v968_v18  ;;  %792 = vmatprep.subr.bf16.mxu1 %v968_v18 }
  0x23   :  { %412 = vmatpush1.bf16.msra.mxu0 %v970_v19  ;;  %808 = vmatpush1.bf16.msra.mxu1 %v970_v19 }
  0x24   :  { %413 = vmatprep.subr.bf16.mxu0 %v971_v20  ;;  %793 = vmatprep.subr.bf16.mxu1 %v971_v20 }
  0x27   :  { %414 = vmatpush1.bf16.msra.mxu0 %v973_v21  ;;  %809 = vmatpush1.bf16.msra.mxu1 %v973_v21 }
  0x28   :  { %415 = vmatprep.subr.bf16.mxu0 %v974_v22  ;;  %794 = vmatprep.subr.bf16.mxu1 %v974_v22 }
  0x2b   :  { %416 = vmatpush1.bf16.msra.mxu0 %v976_v23  ;;  %810 = vmatpush1.bf16.msra.mxu1 %v976_v23 }
  0x2c   :  { %417 = vmatprep.subr.bf16.mxu0 %v977_v24  ;;  %795 = vmatprep.subr.bf16.mxu1 %v977_v24 }
  0x2f   :  { %418 = vmatpush1.bf16.msra.mxu0 %v979_v25  ;;  %811 = vmatpush1.bf16.msra.mxu1 %v979_v25 }
  0x30   :  { %419 = vmatprep.subr.bf16.mxu0 %v980_v26  ;;  %796 = vmatprep.subr.bf16.mxu1 %v980_v26 }
  0x33   :  { %420 = vmatpush1.bf16.msra.mxu0 %v982_v27  ;;  %812 = vmatpush1.bf16.msra.mxu1 %v982_v27 }
  0x34   :  { %421 = vmatprep.subr.bf16.mxu0 %v983_v28  ;;  %797 = vmatprep.subr.bf16.mxu1 %v983_v28 }
  0x37   :  { %422 = vmatpush1.bf16.msra.mxu0 %v985_v29  ;;  %813 = vmatpush1.bf16.msra.mxu1 %v985_v29 }
  0x38   :  { %423 = vmatprep.subr.bf16.mxu0 %v986_v30  ;;  %798 = vmatprep.subr.bf16.mxu1 %v986_v30 }
  0x3b   :  { %424 = vmatpush1.bf16.msra.mxu0 %v988_v31  ;;  %814 = vmatpush1.bf16.msra.mxu1 %v988_v31 }
  0x3c   :  { %425 = vmatprep.subr.bf16.mxu0 %v989_v32  ;;  %799 = vmatprep.subr.bf16.mxu1 %v989_v32 }
  0x3f   :  { %426 = vmatpush1.bf16.msra.mxu0 %v991_v33  ;;  %815 = vmatpush1.bf16.msra.mxu1 %v991_v33 }
  0x42   :  { %428 = vmatmul.mubr.bf16.vlgmr.msra.gmra.mrb[0].mxu0 %v992_v34  ;;  %508 = vmatmul.mubr.bf16.vlgmr.msra.gmra.mrb[0].mxu1 %v995_v35 }
  0x43   :  { %437 = vmatprep.mubr.bf16.mxu0 %v998_v36  ;;  %517 = vmatprep.mubr.bf16.mxu1 %v1000_v37 }
  0x4a   :  { %438 = vmatmul.mubr.bf16.gmra.mrb[4].mxu0 %v1002_v38  ;;  %518 = vmatmul.mubr.bf16.gmra.mrb[4].mxu1 %v1003_v39 }
  0x4b   :  { %447 = vmatprep.mubr.bf16.mxu0 %v1004_v40  ;;  %527 = vmatprep.mubr.bf16.mxu1 %v1006_v41 }
  0x52   :  { %448 = vmatmul.mubr.bf16.gmra.mrb[8].mxu0 %v1008_v42  ;;  %528 = vmatmul.mubr.bf16.gmra.mrb[8].mxu1 %v1009_v43 }
  0x53   :  { %457 = vmatprep.mubr.bf16.mxu0 %v1010_v44  ;;  %537 = vmatprep.mubr.bf16.mxu1 %v1012_v45 }
  0x5a   :  { %458 = vmatmul.mubr.bf16.gmra.mrb[12].mxu0 %v1014_v46  ;;  %538 = vmatmul.mubr.bf16.gmra.mrb[12].mxu1 %v1015_v47 }
  0x5b   :  { %467 = vmatprep.mubr.bf16.mxu0 %v1016_v48  ;;  %547 = vmatprep.mubr.bf16.mxu1 %v1018_v49 }
  0x62   :  { %468 = vmatmul.mubr.bf16.gmra.mrb[16].mxu0 %v1020_v50  ;;  %548 = vmatmul.mubr.bf16.gmra.mrb[16].mxu1 %v1021_v51 }
  0x63   :  { %477 = vmatprep.mubr.bf16.mxu0 %v1022_v52  ;;  %557 = vmatprep.mubr.bf16.mxu1 %v1024_v53 }
  0x6a   :  { %478 = vmatmul.mubr.bf16.gmra.mrb[20].mxu0 %v1026_v54  ;;  %558 = vmatmul.mubr.bf16.gmra.mrb[20].mxu1 %v1027_v55 }
  0x6b   :  { %487 = vmatprep.mubr.bf16.mxu0 %v1028_v56  ;;  %567 = vmatprep.mubr.bf16.mxu1 %v1030_v57 }
  0x72   :  { %488 = vmatmul.mubr.bf16.gmra.mrb[24].mxu0 %v1032_v58  ;;  %568 = vmatmul.mubr.bf16.gmra.mrb[24].mxu1 %v1033_v59 }
  0x73   :  { %497 = vmatprep.mubr.bf16.mxu0 %v1034_v60  ;;  %577 = vmatprep.mubr.bf16.mxu1 %v1036_v61 }
  0x7a   :  { %498 = vmatmul.mubr.bf16.gmra.mrb[28].mxu0 %v1038_v62  ;;  %578 = vmatmul.mubr.bf16.gmra.mrb[28].mxu1 %v1039_v63 }
 0x115   :  { %v429_v0 = vpop.f32.mrb[0].mxu0  ;;  %v509_v1 = vpop.f32.mrb[0].mxu1 }
 0x116   :  { %v816_v2 = vtrunc.f32 %v429_v0  ;;  %v880_v3 = vtrunc.f32 %v509_v1  ;;  %v431_v4 = vpop.f32.mrb[1].mxu0  ;;  %v511_v5 = vpop.f32.mrb[1].mxu1 }
 0x117   :  { %v818_v6 = vtrunc.f32 %v431_v4  ;;  %v882_v7 = vtrunc.f32 %v511_v5  ;;  %v433_v8 = vpop.f32.mrb[2].mxu0  ;;  %v513_v9 = vpop.f32.mrb[2].mxu1 }
 0x118   :  { %v817_v10 = vcvt.f32.s32 %v816_v2  ;;  %v881_v11 = vcvt.f32.s32 %v880_v3  ;;  %v820_v12 = vtrunc.f32 %v433_v8  ;;  %v884_v13 = vtrunc.f32 %v513_v9  ;;  %v435_v14 = vpop.f32.mrb[3].mxu0  ;;  %v515_v15 = vpop.f32.mrb[3].mxu1 }
 0x119   :  { %v819_v16 = vcvt.f32.s32 %v818_v6  ;;  %v883_v17 = vcvt.f32.s32 %v882_v7  ;;  %v822_v18 = vtrunc.f32 %v435_v14  ;;  %v886_v19 = vtrunc.f32 %v515_v15 }
 0x11a   :  { %652 = vst [vmem:[%s1441_s2] sm:$0xff] %v817_v10  ;;  %684 = vst [vmem:[%s1441_s2 + $0x100] sm:$0xff] %v881_v11  ;;  %v821_v20 = vcvt.f32.s32 %v820_v12  ;;  %v885_v21 = vcvt.f32.s32 %v884_v13 }
 0x11b   :  { %653 = vst [vmem:[%s1441_s2 + $0x8] sm:$0xff] %v819_v16  ;;  %685 = vst [vmem:[%s1441_s2 + $0x108] sm:$0xff] %v883_v17  ;;  %v823_v22 = vcvt.f32.s32 %v822_v18  ;;  %v887_v23 = vcvt.f32.s32 %v886_v19 }
 0x11c   :  { %654 = vst [vmem:[%s1441_s2 + $0x10] sm:$0xff] %v821_v20  ;;  %686 = vst [vmem:[%s1441_s2 + $0x110] sm:$0xff] %v885_v21 }
 0x11d   :  { %655 = vst [vmem:[%s1441_s2 + $0x18] sm:$0xff] %v823_v22  ;;  %687 = vst [vmem:[%s1441_s2 + $0x118] sm:$0xff] %v887_v23  ;;  %v439_v24 = vpop.f32.mrb[4].mxu0  ;;  %v519_v25 = vpop.f32.mrb[4].mxu1 }
 0x11e   :  { %v824_v26 = vtrunc.f32 %v439_v24  ;;  %v888_v27 = vtrunc.f32 %v519_v25  ;;  %v441_v28 = vpop.f32.mrb[5].mxu0  ;;  %v521_v29 = vpop.f32.mrb[5].mxu1 }
 0x11f   :  { %v826_v30 = vtrunc.f32 %v441_v28  ;;  %v890_v31 = vtrunc.f32 %v521_v29  ;;  %v443_v32 = vpop.f32.mrb[6].mxu0  ;;  %v523_v33 = vpop.f32.mrb[6].mxu1 }
 0x120   :  { %v825_v34 = vcvt.f32.s32 %v824_v26  ;;  %v889_v35 = vcvt.f32.s32 %v888_v27  ;;  %v828_v36 = vtrunc.f32 %v443_v32  ;;  %v892_v37 = vtrunc.f32 %v523_v33  ;;  %v445_v38 = vpop.f32.mrb[7].mxu0  ;;  %v525_v39 = vpop.f32.mrb[7].mxu1 }
 0x121   :  { %v827_v40 = vcvt.f32.s32 %v826_v30  ;;  %v891_v41 = vcvt.f32.s32 %v890_v31  ;;  %v830_v42 = vtrunc.f32 %v445_v38  ;;  %v894_v43 = vtrunc.f32 %v525_v39 }
 0x122   :  { %656 = vst [vmem:[%s1441_s2 + $0x20] sm:$0xff] %v825_v34  ;;  %688 = vst [vmem:[%s1441_s2 + $0x120] sm:$0xff] %v889_v35  ;;  %v829_v44 = vcvt.f32.s32 %v828_v36  ;;  %v893_v45 = vcvt.f32.s32 %v892_v37 }
 0x123   :  { %657 = vst [vmem:[%s1441_s2 + $0x28] sm:$0xff] %v827_v40  ;;  %689 = vst [vmem:[%s1441_s2 + $0x128] sm:$0xff] %v891_v41  ;;  %v831_v46 = vcvt.f32.s32 %v830_v42  ;;  %v895_v47 = vcvt.f32.s32 %v894_v43 }
 0x124   :  { %658 = vst [vmem:[%s1441_s2 + $0x30] sm:$0xff] %v829_v44  ;;  %690 = vst [vmem:[%s1441_s2 + $0x130] sm:$0xff] %v893_v45 }
 0x125   :  { %659 = vst [vmem:[%s1441_s2 + $0x38] sm:$0xff] %v831_v46  ;;  %691 = vst [vmem:[%s1441_s2 + $0x138] sm:$0xff] %v895_v47  ;;  %v449_v48 = vpop.f32.mrb[8].mxu0  ;;  %v529_v49 = vpop.f32.mrb[8].mxu1 }
 0x126   :  { %v832_v50 = vtrunc.f32 %v449_v48  ;;  %v896_v51 = vtrunc.f32 %v529_v49  ;;  %v451_v52 = vpop.f32.mrb[9].mxu0  ;;  %v531_v53 = vpop.f32.mrb[9].mxu1 }
 0x127   :  { %v834_v54 = vtrunc.f32 %v451_v52  ;;  %v898_v55 = vtrunc.f32 %v531_v53  ;;  %v453_v56 = vpop.f32.mrb[10].mxu0  ;;  %v533_v57 = vpop.f32.mrb[10].mxu1 }
 0x128   :  { %v833_v58 = vcvt.f32.s32 %v832_v50  ;;  %v897_v59 = vcvt.f32.s32 %v896_v51  ;;  %v836_v60 = vtrunc.f32 %v453_v56  ;;  %v900_v61 = vtrunc.f32 %v533_v57  ;;  %v455_v62 = vpop.f32.mrb[11].mxu0  ;;  %v535_v63 = vpop.f32.mrb[11].mxu1 }
 0x129   :  { %v835_v0 = vcvt.f32.s32 %v834_v54  ;;  %v899_v1 = vcvt.f32.s32 %v898_v55  ;;  %v838_v2 = vtrunc.f32 %v455_v62  ;;  %v902_v3 = vtrunc.f32 %v535_v63 }
 0x12a   :  { %660 = vst [vmem:[%s1441_s2 + $0x40] sm:$0xff] %v833_v58  ;;  %692 = vst [vmem:[%s1441_s2 + $0x140] sm:$0xff] %v897_v59  ;;  %v837_v4 = vcvt.f32.s32 %v836_v60  ;;  %v901_v5 = vcvt.f32.s32 %v900_v61 }
 0x12b   :  { %661 = vst [vmem:[%s1441_s2 + $0x48] sm:$0xff] %v835_v0  ;;  %693 = vst [vmem:[%s1441_s2 + $0x148] sm:$0xff] %v899_v1  ;;  %v839_v6 = vcvt.f32.s32 %v838_v2  ;;  %v903_v7 = vcvt.f32.s32 %v902_v3 }
 0x12c   :  { %662 = vst [vmem:[%s1441_s2 + $0x50] sm:$0xff] %v837_v4  ;;  %694 = vst [vmem:[%s1441_s2 + $0x150] sm:$0xff] %v901_v5 }
 0x12d   :  { %663 = vst [vmem:[%s1441_s2 + $0x58] sm:$0xff] %v839_v6  ;;  %695 = vst [vmem:[%s1441_s2 + $0x158] sm:$0xff] %v903_v7  ;;  %v459_v8 = vpop.f32.mrb[12].mxu0  ;;  %v539_v9 = vpop.f32.mrb[12].mxu1 }
 0x12e   :  { %v840_v10 = vtrunc.f32 %v459_v8  ;;  %v904_v11 = vtrunc.f32 %v539_v9  ;;  %v461_v12 = vpop.f32.mrb[13].mxu0  ;;  %v541_v13 = vpop.f32.mrb[13].mxu1 }
 0x12f   :  { %v842_v14 = vtrunc.f32 %v461_v12  ;;  %v906_v15 = vtrunc.f32 %v541_v13  ;;  %v463_v16 = vpop.f32.mrb[14].mxu0  ;;  %v543_v17 = vpop.f32.mrb[14].mxu1 }
 0x130   :  { %v841_v18 = vcvt.f32.s32 %v840_v10  ;;  %v905_v19 = vcvt.f32.s32 %v904_v11  ;;  %v844_v20 = vtrunc.f32 %v463_v16  ;;  %v908_v21 = vtrunc.f32 %v543_v17  ;;  %v465_v22 = vpop.f32.mrb[15].mxu0  ;;  %v545_v23 = vpop.f32.mrb[15].mxu1 }
 0x131   :  { %v843_v24 = vcvt.f32.s32 %v842_v14  ;;  %v907_v25 = vcvt.f32.s32 %v906_v15  ;;  %v846_v26 = vtrunc.f32 %v465_v22  ;;  %v910_v27 = vtrunc.f32 %v545_v23 }
 0x132   :  { %664 = vst [vmem:[%s1441_s2 + $0x60] sm:$0xff] %v841_v18  ;;  %696 = vst [vmem:[%s1441_s2 + $0x160] sm:$0xff] %v905_v19  ;;  %v845_v28 = vcvt.f32.s32 %v844_v20  ;;  %v909_v29 = vcvt.f32.s32 %v908_v21 }
 0x133   :  { %665 = vst [vmem:[%s1441_s2 + $0x68] sm:$0xff] %v843_v24  ;;  %697 = vst [vmem:[%s1441_s2 + $0x168] sm:$0xff] %v907_v25  ;;  %v847_v30 = vcvt.f32.s32 %v846_v26  ;;  %v911_v31 = vcvt.f32.s32 %v910_v27 }
 0x134   :  { %666 = vst [vmem:[%s1441_s2 + $0x70] sm:$0xff] %v845_v28  ;;  %698 = vst [vmem:[%s1441_s2 + $0x170] sm:$0xff] %v909_v29 }
 0x135   :  { %667 = vst [vmem:[%s1441_s2 + $0x78] sm:$0xff] %v847_v30  ;;  %699 = vst [vmem:[%s1441_s2 + $0x178] sm:$0xff] %v911_v31  ;;  %v469_v32 = vpop.f32.mrb[16].mxu0  ;;  %v549_v33 = vpop.f32.mrb[16].mxu1 }
 0x136   :  { %v848_v34 = vtrunc.f32 %v469_v32  ;;  %v912_v35 = vtrunc.f32 %v549_v33  ;;  %v471_v36 = vpop.f32.mrb[17].mxu0  ;;  %v551_v37 = vpop.f32.mrb[17].mxu1 }
 0x137   :  { %v850_v38 = vtrunc.f32 %v471_v36  ;;  %v914_v39 = vtrunc.f32 %v551_v37  ;;  %v473_v40 = vpop.f32.mrb[18].mxu0  ;;  %v553_v41 = vpop.f32.mrb[18].mxu1 }
 0x138   :  { %v849_v42 = vcvt.f32.s32 %v848_v34  ;;  %v913_v43 = vcvt.f32.s32 %v912_v35  ;;  %v852_v44 = vtrunc.f32 %v473_v40  ;;  %v916_v45 = vtrunc.f32 %v553_v41  ;;  %v475_v46 = vpop.f32.mrb[19].mxu0  ;;  %v555_v47 = vpop.f32.mrb[19].mxu1 }
 0x139   :  { %v851_v48 = vcvt.f32.s32 %v850_v38  ;;  %v915_v49 = vcvt.f32.s32 %v914_v39  ;;  %v854_v50 = vtrunc.f32 %v475_v46  ;;  %v918_v51 = vtrunc.f32 %v555_v47 }
 0x13a   :  { %668 = vst [vmem:[%s1441_s2 + $0x80] sm:$0xff] %v849_v42  ;;  %700 = vst [vmem:[%s1441_s2 + $0x180] sm:$0xff] %v913_v43  ;;  %v853_v52 = vcvt.f32.s32 %v852_v44  ;;  %v917_v53 = vcvt.f32.s32 %v916_v45 }
 0x13b   :  { %669 = vst [vmem:[%s1441_s2 + $0x88] sm:$0xff] %v851_v48  ;;  %701 = vst [vmem:[%s1441_s2 + $0x188] sm:$0xff] %v915_v49  ;;  %v855_v54 = vcvt.f32.s32 %v854_v50  ;;  %v919_v55 = vcvt.f32.s32 %v918_v51 }
 0x13c   :  { %670 = vst [vmem:[%s1441_s2 + $0x90] sm:$0xff] %v853_v52  ;;  %702 = vst [vmem:[%s1441_s2 + $0x190] sm:$0xff] %v917_v53 }
 0x13d   :  { %671 = vst [vmem:[%s1441_s2 + $0x98] sm:$0xff] %v855_v54  ;;  %703 = vst [vmem:[%s1441_s2 + $0x198] sm:$0xff] %v919_v55  ;;  %v479_v56 = vpop.f32.mrb[20].mxu0  ;;  %v559_v57 = vpop.f32.mrb[20].mxu1 }
 0x13e   :  { %v856_v58 = vtrunc.f32 %v479_v56  ;;  %v920_v59 = vtrunc.f32 %v559_v57  ;;  %v481_v60 = vpop.f32.mrb[21].mxu0  ;;  %v561_v61 = vpop.f32.mrb[21].mxu1 }
 0x13f   :  { %v858_v62 = vtrunc.f32 %v481_v60  ;;  %v922_v63 = vtrunc.f32 %v561_v61  ;;  %v483_v0 = vpop.f32.mrb[22].mxu0  ;;  %v563_v1 = vpop.f32.mrb[22].mxu1 }
 0x140   :  { %v857_v2 = vcvt.f32.s32 %v856_v58  ;;  %v921_v3 = vcvt.f32.s32 %v920_v59  ;;  %v860_v4 = vtrunc.f32 %v483_v0  ;;  %v924_v5 = vtrunc.f32 %v563_v1  ;;  %v485_v6 = vpop.f32.mrb[23].mxu0  ;;  %v565_v7 = vpop.f32.mrb[23].mxu1 }
 0x141   :  { %v859_v8 = vcvt.f32.s32 %v858_v62  ;;  %v923_v9 = vcvt.f32.s32 %v922_v63  ;;  %v862_v10 = vtrunc.f32 %v485_v6  ;;  %v926_v11 = vtrunc.f32 %v565_v7 }
 0x142   :  { %672 = vst [vmem:[%s1441_s2 + $0xa0] sm:$0xff] %v857_v2  ;;  %704 = vst [vmem:[%s1441_s2 + $0x1a0] sm:$0xff] %v921_v3  ;;  %v861_v12 = vcvt.f32.s32 %v860_v4  ;;  %v925_v13 = vcvt.f32.s32 %v924_v5 }
 0x143   :  { %673 = vst [vmem:[%s1441_s2 + $0xa8] sm:$0xff] %v859_v8  ;;  %705 = vst [vmem:[%s1441_s2 + $0x1a8] sm:$0xff] %v923_v9  ;;  %v863_v14 = vcvt.f32.s32 %v862_v10  ;;  %v927_v15 = vcvt.f32.s32 %v926_v11 }
 0x144   :  { %674 = vst [vmem:[%s1441_s2 + $0xb0] sm:$0xff] %v861_v12  ;;  %706 = vst [vmem:[%s1441_s2 + $0x1b0] sm:$0xff] %v925_v13 }
 0x145   :  { %675 = vst [vmem:[%s1441_s2 + $0xb8] sm:$0xff] %v863_v14  ;;  %707 = vst [vmem:[%s1441_s2 + $0x1b8] sm:$0xff] %v927_v15  ;;  %v489_v16 = vpop.f32.mrb[24].mxu0  ;;  %v569_v17 = vpop.f32.mrb[24].mxu1 }
 0x146   :  { %v864_v18 = vtrunc.f32 %v489_v16  ;;  %v928_v19 = vtrunc.f32 %v569_v17  ;;  %v491_v20 = vpop.f32.mrb[25].mxu0  ;;  %v571_v21 = vpop.f32.mrb[25].mxu1 }
 0x147   :  { %v866_v22 = vtrunc.f32 %v491_v20  ;;  %v930_v23 = vtrunc.f32 %v571_v21  ;;  %v493_v24 = vpop.f32.mrb[26].mxu0  ;;  %v573_v25 = vpop.f32.mrb[26].mxu1 }
 0x148   :  { %v865_v26 = vcvt.f32.s32 %v864_v18  ;;  %v929_v27 = vcvt.f32.s32 %v928_v19  ;;  %v868_v28 = vtrunc.f32 %v493_v24  ;;  %v932_v29 = vtrunc.f32 %v573_v25  ;;  %v495_v30 = vpop.f32.mrb[27].mxu0  ;;  %v575_v31 = vpop.f32.mrb[27].mxu1 }
 0x149   :  { %v867_v32 = vcvt.f32.s32 %v866_v22  ;;  %v931_v33 = vcvt.f32.s32 %v930_v23  ;;  %v870_v34 = vtrunc.f32 %v495_v30  ;;  %v934_v35 = vtrunc.f32 %v575_v31 }
 0x14a   :  { %676 = vst [vmem:[%s1441_s2 + $0xc0] sm:$0xff] %v865_v26  ;;  %708 = vst [vmem:[%s1441_s2 + $0x1c0] sm:$0xff] %v929_v27  ;;  %v869_v36 = vcvt.f32.s32 %v868_v28  ;;  %v933_v37 = vcvt.f32.s32 %v932_v29 }
 0x14b   :  { %677 = vst [vmem:[%s1441_s2 + $0xc8] sm:$0xff] %v867_v32  ;;  %709 = vst [vmem:[%s1441_s2 + $0x1c8] sm:$0xff] %v931_v33  ;;  %v871_v38 = vcvt.f32.s32 %v870_v34  ;;  %v935_v39 = vcvt.f32.s32 %v934_v35 }
 0x14c   :  { %678 = vst [vmem:[%s1441_s2 + $0xd0] sm:$0xff] %v869_v36  ;;  %710 = vst [vmem:[%s1441_s2 + $0x1d0] sm:$0xff] %v933_v37 }
 0x14d   :  { %679 = vst [vmem:[%s1441_s2 + $0xd8] sm:$0xff] %v871_v38  ;;  %711 = vst [vmem:[%s1441_s2 + $0x1d8] sm:$0xff] %v935_v39  ;;  %v499_v40 = vpop.f32.mrb[28].mxu0  ;;  %v579_v41 = vpop.f32.mrb[28].mxu1 }
 0x14e   :  { %v872_v42 = vtrunc.f32 %v499_v40  ;;  %v936_v43 = vtrunc.f32 %v579_v41  ;;  %v501_v44 = vpop.f32.mrb[29].mxu0  ;;  %v581_v45 = vpop.f32.mrb[29].mxu1 }
 0x14f   :  { %v874_v46 = vtrunc.f32 %v501_v44  ;;  %v938_v47 = vtrunc.f32 %v581_v45  ;;  %v503_v48 = vpop.f32.mrb[30].mxu0  ;;  %v583_v49 = vpop.f32.mrb[30].mxu1 }
 0x150   :  { %v873_v50 = vcvt.f32.s32 %v872_v42  ;;  %v937_v51 = vcvt.f32.s32 %v936_v43  ;;  %v876_v52 = vtrunc.f32 %v503_v48  ;;  %v940_v53 = vtrunc.f32 %v583_v49  ;;  %v505_v54 = vpop.f32.mrb[31].mxu0  ;;  %v585_v55 = vpop.f32.mrb[31].mxu1 }
 0x151   :  { %v875_v56 = vcvt.f32.s32 %v874_v46  ;;  %v939_v57 = vcvt.f32.s32 %v938_v47  ;;  %v878_v58 = vtrunc.f32 %v505_v54  ;;  %v942_v59 = vtrunc.f32 %v585_v55 }
 0x152   :  { %680 = vst [vmem:[%s1441_s2 + $0xe0] sm:$0xff] %v873_v50  ;;  %712 = vst [vmem:[%s1441_s2 + $0x1e0] sm:$0xff] %v937_v51  ;;  %v877_v60 = vcvt.f32.s32 %v876_v52  ;;  %v941_v61 = vcvt.f32.s32 %v940_v53 }
 0x153   :  { %681 = vst [vmem:[%s1441_s2 + $0xe8] sm:$0xff] %v875_v56  ;;  %713 = vst [vmem:[%s1441_s2 + $0x1e8] sm:$0xff] %v939_v57  ;;  %v879_v62 = vcvt.f32.s32 %v878_v58  ;;  %v943_v63 = vcvt.f32.s32 %v942_v59 }
 0x154   :  { %682 = vst [vmem:[%s1441_s2 + $0xf0] sm:$0xff] %v877_v60  ;;  %714 = vst [vmem:[%s1441_s2 + $0x1f0] sm:$0xff] %v941_v61 }
 0x155   :  { %683 = vst [vmem:[%s1441_s2 + $0xf8] sm:$0xff] %v879_v62  ;;  %715 = vst [vmem:[%s1441_s2 + $0x1f8] sm:$0xff] %v943_v63 }

</bundles_post_ra>
